<compile_context>
chip_gen: v5e
topology: v5e:2x2
jax: 0.10.0
libtpu: 0.0.40
codegen_flags: <defaults>
</compile_context>

<pallas_src>
import numpy as np
import jax
import jax.numpy as jnp
from jax.experimental import pallas as pl
from jax.experimental.pallas import tpu as pltpu


def _round_up(x, m):
    return ((x + m - 1) // m) * m


# ----------------------------- kernels --------------------------------------


def xw_kernel(x_ref, w_ref, z_ref):
    # z row tile = X_row_tile @ W (F_in / F_out padded to multiples of 128 ->
    # full-width MXU operands, unmasked lane-dense stores).
    z_ref[...] = jnp.dot(
        x_ref[...], w_ref[...], preferred_element_type=jnp.float32
    ).astype(z_ref.dtype)


def az_bias_kernel_resident(a_ref, z_ref, b_ref, out_ref):
    # out row tile = bias + sum_k A[i,k] @ z[k]; z is fully VMEM-resident
    # (constant block index), sliced per reduction step with pl.ds.
    # out_ref (f32) is resident across k and serves as the accumulator.
    k = pl.program_id(1)
    tk = a_ref.shape[1]

    @pl.when(k == 0)
    def _():
        out_ref[...] = jnp.broadcast_to(b_ref[...], out_ref.shape)

    start = pl.multiple_of(k * tk, tk)
    z_tile = z_ref[pl.ds(start, tk), :]
    out_ref[...] += jnp.dot(a_ref[...], z_tile, preferred_element_type=jnp.float32)


def az_bias_kernel_tiled(a_ref, z_ref, b_ref, out_ref):
    # Fallback when z does not fit in VMEM: z is streamed one (tk, F_out) tile
    # per reduction step.  out_ref (f32, resident across k) is the accumulator.
    k = pl.program_id(1)

    @pl.when(k == 0)
    def _():
        out_ref[...] = jnp.broadcast_to(b_ref[...], out_ref.shape)

    out_ref[...] += jnp.dot(
        a_ref[...], z_ref[...], preferred_element_type=jnp.float32
    )


# ----------------------------- wrapper ---------------------------------------


def graph_convolution_block(x, weight, new_adj, bias=None, *, row_tile=1024,
                            use_bf16=True, z_resident=None):
    """x: [N, F_in], weight: [F_in, F_out], new_adj: [N, N], bias: [F_out] | None.

    Returns (z, out) matching the PyTorch module's forward.
    use_bf16: stream A and z into kernel 2 as bf16 (f32 accumulation).
    z_resident: force/disable the VMEM-resident-z path (None = auto by size).
    """
    n, f_in = x.shape
    f_out = weight.shape[1]
    f32 = jnp.float32

    if bias is None:
        bias = jnp.zeros((f_out,), dtype=f32)

    # --- pad to TPU-friendly shapes (zero padding -> results unchanged) ------
    f_in_pad = _round_up(f_in, 128)
    f_out_pad = _round_up(f_out, 128)
    n_pad0 = _round_up(n, 128)
    tm = min(row_tile, n_pad0)          # output-row tile (and A row tile)
    n_pad = _round_up(n_pad0, tm)       # make the tile divide N exactly
    tk = tm                             # reduction tile over nodes for A @ z

    x_p = jnp.pad(x.astype(f32), ((0, n_pad - n), (0, f_in_pad - f_in)))
    w_p = jnp.pad(weight.astype(f32), ((0, f_in_pad - f_in), (0, f_out_pad - f_out)))
    b_p = jnp.pad(bias.astype(f32), (0, f_out_pad - f_out)).reshape(1, f_out_pad)

    mat_dtype = jnp.bfloat16 if use_bf16 else f32
    bytes_per = 2 if use_bf16 else 4
    a_p = jnp.pad(
        new_adj.astype(f32), ((0, n_pad - n), (0, n_pad - n))
    ).astype(mat_dtype)

    # --- kernel 1: z = X @ W (f32, exact) -------------------------------------
    z_pad = pl.pallas_call(
        xw_kernel,
        out_shape=jax.ShapeDtypeStruct((n_pad, f_out_pad), f32),
        grid_spec=pltpu.PrefetchScalarGridSpec(
            num_scalar_prefetch=0,
            grid=(n_pad // tm,),
            in_specs=[
                pl.BlockSpec((tm, f_in_pad), lambda i: (i, 0)),
                pl.BlockSpec((f_in_pad, f_out_pad), lambda i: (0, 0)),
            ],
            out_specs=pl.BlockSpec((tm, f_out_pad), lambda i: (i, 0)),
        ),
        compiler_params=pltpu.CompilerParams(
            dimension_semantics=("parallel",)
        ),
        cost_estimate=pl.CostEstimate(
            flops=2 * n_pad * f_in_pad * f_out_pad,
            transcendentals=0,
            bytes_accessed=4 * (n_pad * f_in_pad + f_in_pad * f_out_pad
                                + n_pad * f_out_pad),
        ),
    )(x_p, w_p)

    # z operand for the second matmul (bf16 halves the stream; f32 z returned).
    z_mat = z_pad.astype(mat_dtype)

    # --- kernel 2: out = A @ z + bias -----------------------------------------
    z_bytes = n_pad * f_out_pad * bytes_per
    if z_resident is None:
        z_resident = z_bytes <= (4 << 20)   # keep 2x-buffer worst case in budget

    if z_resident:
        kern = az_bias_kernel_resident
        z_spec = pl.BlockSpec((n_pad, f_out_pad), lambda i, k: (0, 0))
        z_hbm_bytes = z_bytes
    else:
        kern = az_bias_kernel_tiled
        z_spec = pl.BlockSpec((tk, f_out_pad), lambda i, k: (k, 0))
        z_hbm_bytes = (n_pad // tm) * z_bytes   # z re-read once per row block

    out_pad = pl.pallas_call(
        kern,
        out_shape=jax.ShapeDtypeStruct((n_pad, f_out_pad), f32),
        grid_spec=pltpu.PrefetchScalarGridSpec(
            num_scalar_prefetch=0,
            grid=(n_pad // tm, n_pad // tk),
            in_specs=[
                pl.BlockSpec((tm, tk), lambda i, k: (i, k)),          # A tile
                z_spec,                                               # z
                pl.BlockSpec((1, f_out_pad), lambda i, k: (0, 0)),    # bias
            ],
            out_specs=pl.BlockSpec((tm, f_out_pad), lambda i, k: (i, 0)),
        ),
        compiler_params=pltpu.CompilerParams(
            dimension_semantics=("parallel", "arbitrary")
        ),
        cost_estimate=pl.CostEstimate(
            flops=2 * n_pad * n_pad * f_out_pad,
            transcendentals=0,
            bytes_accessed=(n_pad * n_pad * bytes_per        # A stream
                            + z_hbm_bytes                    # z reads
                            + n_pad * f_out_pad * 4          # out writes
                            + f_out_pad * 4),                # bias
        ),
    )(a_p, z_mat, b_p)

    # Slice the zero padding off outside the kernels (lane-dense stores inside).
    return z_pad[:n, :f_out], out_pad[:n, :f_out]


def normalize_adj(adj):
    """Glue (plain JAX, module __init__): adj.fill_diagonal_(1); D=diag(1/sqrt(rowsum)); D@adj@D."""
    n = adj.shape[0]
    adj = jnp.where(jnp.eye(n, dtype=bool), 1.0, adj)
    d = 1.0 / jnp.sqrt(jnp.sum(adj, axis=1))
    return adj * d[:, None] * d[None, :]


# ----------------------------- demo / check ----------------------------------

if __name__ == "__main__":
    # Small, deterministic problem (non-multiples of 128 to exercise padding).
    N = 300
    IN_FEAT = 48
    OUT_FEAT = 96

    key = jax.random.PRNGKey(0)
    k_adj, k_x, k_w, k_b = jax.random.split(key, 4)

    # Random symmetric 0/1 adjacency, then GCN normalization (module __init__).
    a_raw = (jax.random.uniform(k_adj, (N, N)) > 0.8).astype(jnp.float32)
    adj = jnp.maximum(a_raw, a_raw.T)
    new_adj = normalize_adj(adj)

    # Input features.
    x = jax.random.normal(k_x, (N, IN_FEAT), dtype=jnp.float32)

    # Parameters, initialized as in the PyTorch module: uniform(-lam, lam), lam=1/sqrt(out_features).
    lam = 1.0 / np.sqrt(OUT_FEAT)
    weight = jax.random.uniform(k_w, (IN_FEAT, OUT_FEAT), minval=-lam, maxval=lam,
                                dtype=jnp.float32)
    bias = jax.random.uniform(k_b, (OUT_FEAT,), minval=-lam, maxval=lam,
                              dtype=jnp.float32)

    # Reference in plain JAX (f32).
    z_ref = x @ weight
    out_ref = new_adj @ z_ref + bias

    # Small row tile so the toy problem still exercises a multi-step grid
    # (row axis x reduction axis).  Run both kernel-2 variants.
    for resident in (True, False):
        z, out = graph_convolution_block(
            x, weight, new_adj, bias, row_tile=128, use_bf16=True,
            z_resident=resident)
        jax.block_until_ready((z, out))

        # z is computed in pure f32 -> tight check.
        np.testing.assert_allclose(np.asarray(z), np.asarray(z_ref),
                                   rtol=1e-4, atol=1e-4)
        # out uses bf16 A/z streams with f32 accumulation -> looser check.
        np.testing.assert_allclose(np.asarray(out), np.asarray(out_ref),
                                   rtol=2e-2, atol=2e-2)

    print("KERNEL_OK")
</pallas_src>

<mosaic_0001>
module attributes {stable_mosaic.version = 11 : i64} {
  func.func @xw_kernel(%arg0: i32, %arg1: memref<128x128xf32, #tpu.memory_space<vmem>>, %arg2: memref<128x128xf32, #tpu.memory_space<vmem>>, %arg3: memref<128x128xf32, #tpu.memory_space<vmem>>) attributes {dimension_semantics = [#tpu.dimension_semantics<parallel>], iteration_bounds = array<i64: 3>, scalar_prefetch = 0 : i64, scratch_operands = 0 : i64, tpu.core_type = #tpu.core_type<tc>, window_params = [{transform_indices = @transform_0, window_bounds = array<i64: 128, 128>}, {pipeline_mode = #tpu.pipeline_mode<synchronous>, transform_indices = @transform_1, window_bounds = array<i64: 128, 128>}, {transform_indices = @transform_2, window_bounds = array<i64: 128, 128>}]} {
    %c0 = arith.constant 0 : index
    %c0_0 = arith.constant 0 : index
    %0 = vector.load %arg1[%c0, %c0_0] : memref<128x128xf32, #tpu.memory_space<vmem>>, vector<128x128xf32>
    %c0_1 = arith.constant 0 : index
    %c0_2 = arith.constant 0 : index
    %1 = vector.load %arg2[%c0_1, %c0_2] : memref<128x128xf32, #tpu.memory_space<vmem>>, vector<128x128xf32>
    %cst = arith.constant dense<0.000000e+00> : vector<128x128xf32>
    %2 = tpu.matmul %0, %1, %cst {dimension_numbers = #tpu.dot_dimension_numbers<[1], [0], [0], [1], [0, 0, 1, 1], [], []>} : vector<128x128xf32>, vector<128x128xf32>, vector<128x128xf32> -> vector<128x128xf32>
    %c0_3 = arith.constant 0 : index
    %c0_4 = arith.constant 0 : index
    %3 = vector.load %arg3[%c0_3, %c0_4] : memref<128x128xf32, #tpu.memory_space<vmem>>, vector<128x128xf32>
    tpu.vector_store %arg3[%c0_3, %c0_4], %2 {strides = array<i32>} : memref<128x128xf32, #tpu.memory_space<vmem>>, vector<128x128xf32>,
    return
  }
  func.func @transform_0(%arg0: i32) -> (i32, i32) {
    %c0_i32 = arith.constant 0 : i32
    %c0_i32_0 = arith.constant 0 : i32
    return %arg0, %c0_i32 : i32, i32
  }
  func.func @transform_1(%arg0: i32) -> (i32, i32) {
    %c0_i32 = arith.constant 0 : i32
    %c0_i32_0 = arith.constant 0 : i32
    %c0_i32_1 = arith.constant 0 : i32
    return %c0_i32, %c0_i32_0 : i32, i32
  }
  func.func @transform_2(%arg0: i32) -> (i32, i32) {
    %c0_i32 = arith.constant 0 : i32
    %c0_i32_0 = arith.constant 0 : i32
    return %arg0, %c0_i32 : i32, i32
  }
}

</mosaic_0001>

<bundles_post_ra>
// kernel: tpu_custom_call.1
= control target key start
LH: loop header
LB: loop body
LE: loop exit
PB: predicated region body
PF: predicated region fallthrough
CT: control target
= control target key end

     0   :  { %7 = vsyncpa [#allocation3], 0  ;;  %s857_s0 = inlined_call_operand.hbm [shape: f32[384,128], index: 0, kind: input, shape index: {}]   ;;  %s858_s1 = inlined_call_operand.hbm [shape: f32[128,128], index: 1, kind: input, shape index: {}]   ;;  %s859_s2 = inlined_call_operand.hbm [shape: f32[384,128], index: 2, kind: output, shape index: {}]  }
   0x1   :  { %9 = vsyncpa [#allocation3 + $0x1], 0 }
   0x2   :  { %10 = vsyncpa [#allocation6], 0 }
   0x3   :  { %11 = vsyncpa [#allocation4], 0 }
   0x4   :  { %13 = vsyncpa [#allocation4 + $0x1], 0  ;;  %s674_s9 = smov 0   ;;  %s676_s10 = smov 0  }
   0x5   :  { %s678_s11 = smov 0   ;;  %s680_s12 = smov 0  }
   0x6 LB: > { %s695_s13 = sadd.s32 4294967295, %s652_s12   ;;  %s395_s14 = sadd.s32 4294967294, %s652_s12   ;;  %s652_s12 = sphi %s680_s12, %s868_s12   ;;  %s648_s11 = sphi %s678_s11, %s867_s11   ;;  %s644_s10 = sphi %s676_s10, %s866_s10   ;;  %s640_s9 = sphi %s674_s9, %s865_s9  }
   0x7   : > { %p39_p0 = scmp.ne.s32.totalorder %s644_s10, %s640_s9  ;;  %p40_p1 = scmp.eq.s32.totalorder %s695_s13, 0 }
   0x8   : > { %p84_p2 = scmp.eq.s32.totalorder %s695_s13, 2  ;;  %p90_p3 = scmp.eq.s32.totalorder %s395_s14, 2 }
   0x9   : > { %p704_p4 = por %p40_p1, %p39_p0  ;;  %p396_p5 = scmp.ge.s32.totalorder %s652_s12, 1 }
   0xa   : > { %p709_p6 = por %p90_p3, %p39_p0  ;;  %p97_p7 = scmp.lt.s32.totalorder %s652_s12, 4 }
   0xb   : > { %s108_s19 = sshll.u32 %s858_s1, 4  ;;  %s654_s21 = smov [#allocation5]   ;;  %s109_s19 = int_to_ptr.hbm [resolvable:$true] %s108_s19 }
   0xc   : > { %p717_p8 = pnand %p396_p5, %p97_p7  ;;  %s110_s22 = sshll.u32 %s654_s21, 4  ;;  %s111_s22 = int_to_ptr.vmem [resolvable:$true] %s110_s22 }
   0xd   : > { %s726_s23 = sadd.s32 1, %s652_s12   ;;  %s655_s24 = smov 128  }
   0xe   : > { %p469_p9 = pneg %p717_p8  ;;  %s656_s25 = smov 8  }
   0xf   : > { %s23_s26 = ssub.s32 %s652_s12, %s726_s23  ;;  %s26_s27 = sadd.s32 1, %s648_s11 }
  0x10   : > { %p470_p10 = pnand %p469_p9, %p40_p1  ;;  %p24_p11 = scmp.eq.s32.totalorder %s23_s26, 0 }
  0x11   : > { %p33_p12 = scmp.ne.s32.totalorder %s648_s11, %s644_s10  ;;  %p34_p13 = scmp.eq.s32.totalorder %s652_s12, 0 }
  0x12   : > { %472 = dma.hbm_to_vmem [thread:$0]  (!%p470_p10), %s109_s19, 2048, %s111_s22, [#allocation6], %s655_s24, %s655_s24, %s656_s25  }
  0x13   : > { %s738_s28 = scalar_select %p24_p11, %s648_s11, %s26_s27  }
  0x14   : > { %p742_p0 = por %p84_p2, %p33_p12  ;;  %p482_p3 = scmp.lt.s32.totalorder %s652_s12, 3 }
  0x15   : > { %s124_s30 = sand.u32 1, %s648_s11   ;;  %s411_s3 = sshll.u32 %s652_s12, 7 }
  0x16   : > { %p35_p5 = por %p34_p13, %p33_p12  ;;  %s399_s4 = sshll.u32 %s124_s30, 7 }
  0x17   : > { %s133_s7 = scalar_lea.hbm %s857_s0, %s411_s3  ;;  %s128_s14 = scalar_lea.vmem [#allocation2], %s399_s4 }
  0x18   : > { %s134_s8 = sshll.u32 %s133_s7, 4  ;;  %s136_s17 = sshll.u32 %s128_s14, 4  ;;  %s135_s8 = int_to_ptr.hbm [resolvable:$true] %s134_s8  ;;  %s137_s17 = int_to_ptr.vmem [resolvable:$true] %s136_s17 }
  0x19   : > { %p752_p7 = pnand %p482_p3, %p35_p5  ;;  %s125_s19 = scalar_lea.sflag [#allocation3], %s124_s30 }
  0x1a   : > { %s552_s21 = sshra.s32 %s135_s8, 4  ;;  %s559_s3 = scalar_lea.hbm %s857_s0, 384  ;;  %s553_s21 = int_to_ptr.hbm [resolvable:$true] %s552_s21 }
  0x1b   : > { %s554_s22 = scalar_lea.hbm %s553_s21, 128  ;;  %p556_p9 = pneg %p752_p7 }
  0x1c   : > { %p555_p2 = scmp.ne.s32.totalorder %s553_s21, %s554_s22  ;;  %p560_p12 = scmp.lt.s32.totalorder %s553_s21, %s857_s0 }
  0x1d   : > { %p561_p13 = scmp.lt.s32.totalorder %s559_s3, %s554_s22 }
  0x1e   : > { %p557_p10 = pnand %p556_p9, %p555_p2 }
  0x1f   : > { %p562_p3 = por %p561_p13, %p560_p12 }
  0x20   : > { %p558_p11 = pneg %p557_p10 }
  0x22   : > { %p563_p5 = pnand %p562_p3, %p558_p11 }
  0x24   : > { %566 = shalt.err (!%p563_p5)
}
  0x25   : > { %476 = dma.hbm_to_vmem [thread:$0]  (!%p752_p7), %s135_s8, 2048, %s137_s17, %s125_s19, %s655_s24, %s655_s24, %s656_s25  }
  0x26   : > { %148 = sbr.rel (%p717_p8) target bundleno = 239 (0xef), region = 28  ;;  %s772_s30 = sand.u32 (!%p717_p8), 1, %s644_s10  }
  0x27   : > { %s403_s6 = sshll.u32 (!%p717_p8), %s772_s30, 7  ;;  %s151_s7 = scalar_lea.sflag (!%p717_p8), [#allocation3], %s772_s30 }
  0x28   : > { %s778_s14 = scalar_lea.vmem (!%p717_p8), [#allocation2], %s403_s6 }
  0x2b   : > { %627 = dma.done.wait (%p704_p4), %s151_s7, 2048  }
  0x2c   : > { %629 = vsyncadd (%p704_p4), %s151_s7, 4294965248 }
  0x2d   : > { %631 = dma.done.wait (%p40_p1), [#allocation6], 2048  }
  0x2e   : > { %633 = vsyncadd (%p40_p1), [#allocation6], 4294965248  ;;  %v214_v0 = vld [vmem:[#allocation5 + $0x78] sm:$0xff]  ;;  %v213_v1 = vld [vmem:[#allocation5 + $0x70] sm:$0xff]  ;;  %s806_s15 = scalar_lea.vmem [#allocation7], %s403_s6  ;;  %s412_s20 = sshll.u32 %s695_s13, 7 }
  0x2f   : > { %414 = vmatpush.msra.mxu2 %v214_v0  ;;  %415 = vmatpush.msra.mxu3 %v214_v0  ;;  %v212_v2 = vld [vmem:[#allocation5 + $0x68] sm:$0xff]  ;;  %v211_v3 = vld [vmem:[#allocation5 + $0x60] sm:$0xff]  ;;  %v210_v4 = vld [vmem:[#allocation5 + $0x58] sm:$0xff]  ;;  %s308_s8 = scalar_lea.hbm %s859_s2, %s412_s20  ;;  %s309_s17 = sshll.u32 %s806_s15, 4  ;;  %s310_s17 = int_to_ptr.vmem [resolvable:$true] %s309_s17 }
  0x30   : > { %215 = vmatpush.msra.mxu0 %v214_v0  ;;  %413 = vmatpush.msra.mxu1 %v214_v0  ;;  %v209_v5 = vld [vmem:[#allocation5 + $0x50] sm:$0xff]  ;;  %v208_v6 = vld [vmem:[#allocation5 + $0x48] sm:$0xff]  ;;  %v207_v7 = vld [vmem:[#allocation5 + $0x40] sm:$0xff]  ;;  %s311_s18 = sshll.u32 %s308_s8, 4  ;;  %s297_s13 = scalar_lea.sflag [#allocation4], %s772_s30  ;;  %s312_s18 = int_to_ptr.hbm [resolvable:$true] %s311_s18 }
  0x31   : > { %417 = vmatpush.msra.mxu2 %v213_v1  ;;  %418 = vmatpush.msra.mxu3 %v213_v1  ;;  %v206_v8 = vld [vmem:[#allocation5 + $0x38] sm:$0xff]  ;;  %v205_v9 = vld [vmem:[#allocation5 + $0x30] sm:$0xff]  ;;  %v204_v10 = vld [vmem:[#allocation5 + $0x28] sm:$0xff]  ;;  %s596_s19 = sshra.s32 %s312_s18, 4  ;;  %s602_s27 = scalar_lea.hbm %s859_s2, 384  ;;  %s597_s19 = int_to_ptr.hbm [resolvable:$true] %s596_s19 }
  0x32   : > { %216 = vmatpush.msra.mxu0 %v213_v1  ;;  %416 = vmatpush.msra.mxu1 %v213_v1  ;;  %v203_v11 = vld [vmem:[#allocation5 + $0x20] sm:$0xff]  ;;  %v202_v12 = vld [vmem:[#allocation5 + $0x18] sm:$0xff]  ;;  %v201_v13 = vld [vmem:[#allocation5 + $0x10] sm:$0xff]  ;;  %s598_s21 = scalar_lea.hbm %s597_s19, 128  ;;  %p603_p7 = scmp.lt.s32.totalorder %s597_s19, %s859_s2 }
  0x33   : > { %420 = vmatpush.msra.mxu2 %v212_v2  ;;  %421 = vmatpush.msra.mxu3 %v212_v2  ;;  %v200_v14 = vld [vmem:[#allocation5 + $0x8] sm:$0xff]  ;;  %v199_v15 = vld [vmem:[#allocation5] sm:$0xff]  ;;  %v193_v24 = vld [vmem:[%s778_s14 + $0x50] sm:$0xff]  ;;  %p599_p1 = scmp.ne.s32.totalorder %s597_s19, %s598_s21  ;;  %p604_p2 = scmp.lt.s32.totalorder %s602_s27, %s598_s21 }
  0x34   : > { %217 = vmatpush.msra.mxu0 %v212_v2  ;;  %419 = vmatpush.msra.mxu1 %v212_v2  ;;  %v191_v16 = vld [vmem:[%s778_s14 + $0x40] sm:$0xff]  ;;  %v192_v20 = vld [vmem:[%s778_s14 + $0x48] sm:$0xff]  ;;  %v197_v25 = vld [vmem:[%s778_s14 + $0x70] sm:$0xff] }
  0x35   : > { %423 = vmatpush.msra.mxu2 %v211_v3  ;;  %424 = vmatpush.msra.mxu3 %v211_v3  ;;  %v195_v17 = vld [vmem:[%s778_s14 + $0x60] sm:$0xff]  ;;  %v196_v21 = vld [vmem:[%s778_s14 + $0x68] sm:$0xff]  ;;  %v185_v26 = vld [vmem:[%s778_s14 + $0x10] sm:$0xff]  ;;  %p600_p4 = pnand %p599_p1, %p742_p0  ;;  %p605_p9 = por %p604_p2, %p603_p7 }
  0x36   : > { %218 = vmatpush.msra.mxu0 %v211_v3  ;;  %422 = vmatpush.msra.mxu1 %v211_v3  ;;  %v183_v18 = vld [vmem:[%s778_s14] sm:$0xff]  ;;  %v184_v22 = vld [vmem:[%s778_s14 + $0x8] sm:$0xff]  ;;  %v189_v27 = vld [vmem:[%s778_s14 + $0x30] sm:$0xff] }
  0x37   : > { %426 = vmatpush.msra.mxu2 %v210_v4  ;;  %427 = vmatpush.msra.mxu3 %v210_v4  ;;  %v187_v19 = vld [vmem:[%s778_s14 + $0x20] sm:$0xff]  ;;  %v188_v23 = vld [vmem:[%s778_s14 + $0x28] sm:$0xff]  ;;  %v194_v28 = vld [vmem:[%s778_s14 + $0x58] sm:$0xff]  ;;  %p601_p8 = pneg %p600_p4 }
  0x38   : > { %219 = vmatpush.msra.mxu0 %v210_v4  ;;  %425 = vmatpush.msra.mxu1 %v210_v4  ;;  %v198_v29 = vld [vmem:[%s778_s14 + $0x78] sm:$0xff] }
  0x39   : > { %429 = vmatpush.msra.mxu2 %v209_v5  ;;  %430 = vmatpush.msra.mxu3 %v209_v5  ;;  %v186_v30 = vld [vmem:[%s778_s14 + $0x18] sm:$0xff]  ;;  %p606_p10 = pnand %p605_p9, %p601_p8 }
  0x3a   : > { %220 = vmatpush.msra.mxu0 %v209_v5  ;;  %428 = vmatpush.msra.mxu1 %v209_v5  ;;  %v190_v31 = vld [vmem:[%s778_s14 + $0x38] sm:$0xff] }
  0x3b   : > { %432 = vmatpush.msra.mxu2 %v208_v6  ;;  %433 = vmatpush.msra.mxu3 %v208_v6 }
  0x3c   : > { %221 = vmatpush.msra.mxu0 %v208_v6  ;;  %431 = vmatpush.msra.mxu1 %v208_v6 }
  0x3d   : > { %435 = vmatpush.msra.mxu2 %v207_v7  ;;  %436 = vmatpush.msra.mxu3 %v207_v7 }
  0x3e   : > { %222 = vmatpush.msra.mxu0 %v207_v7  ;;  %434 = vmatpush.msra.mxu1 %v207_v7 }
  0x3f   : > { %438 = vmatpush.msra.mxu2 %v206_v8  ;;  %439 = vmatpush.msra.mxu3 %v206_v8 }
  0x40   : > { %223 = vmatpush.msra.mxu0 %v206_v8  ;;  %437 = vmatpush.msra.mxu1 %v206_v8 }
  0x41   : > { %441 = vmatpush.msra.mxu2 %v205_v9  ;;  %442 = vmatpush.msra.mxu3 %v205_v9 }
  0x42   : > { %224 = vmatpush.msra.mxu0 %v205_v9  ;;  %440 = vmatpush.msra.mxu1 %v205_v9 }
  0x43   : > { %444 = vmatpush.msra.mxu2 %v204_v10  ;;  %445 = vmatpush.msra.mxu3 %v204_v10 }
  0x44   : > { %225 = vmatpush.msra.mxu0 %v204_v10  ;;  %443 = vmatpush.msra.mxu1 %v204_v10 }
  0x45   : > { %447 = vmatpush.msra.mxu2 %v203_v11  ;;  %448 = vmatpush.msra.mxu3 %v203_v11 }
  0x46   : > { %226 = vmatpush.msra.mxu0 %v203_v11  ;;  %446 = vmatpush.msra.mxu1 %v203_v11 }
  0x47   : > { %450 = vmatpush.msra.mxu2 %v202_v12  ;;  %451 = vmatpush.msra.mxu3 %v202_v12 }
  0x48   : > { %227 = vmatpush.msra.mxu0 %v202_v12  ;;  %449 = vmatpush.msra.mxu1 %v202_v12 }
  0x49   : > { %453 = vmatpush.msra.mxu2 %v201_v13  ;;  %454 = vmatpush.msra.mxu3 %v201_v13 }
  0x4a   : > { %228 = vmatpush.msra.mxu0 %v201_v13  ;;  %452 = vmatpush.msra.mxu1 %v201_v13 }
  0x4b   : > { %456 = vmatpush.msra.mxu2 %v200_v14  ;;  %457 = vmatpush.msra.mxu3 %v200_v14 }
  0x4c   : > { %229 = vmatpush.msra.mxu0 %v200_v14  ;;  %455 = vmatpush.msra.mxu1 %v200_v14 }
  0x4d   : > { %459 = vmatpush.msra.mxu2 %v199_v15  ;;  %460 = vmatpush.msra.mxu3 %v199_v15 }
  0x4e   : > { %255 = vmatmul.f32.vlgmr.msra.gmra.mxu2 %v191_v16  ;;  %267 = vmatmul.f32.vlgmr.msra.gmra.mxu3 %v195_v17 }
  0x4f   : > { %230 = vmatpush.msra.mxu0 %v199_v15  ;;  %458 = vmatpush.msra.mxu1 %v199_v15 }
  0x50   : > { %231 = vmatmul.f32.vlgmr.msra.gmra.mxu0 %v183_v18  ;;  %243 = vmatmul.f32.vlgmr.msra.gmra.mxu1 %v187_v19 }
  0x56   : > { %258 = vmatmul.f32.gmra.mxu2 %v192_v20  ;;  %270 = vmatmul.f32.gmra.mxu3 %v196_v21 }
  0x58   : > { %234 = vmatmul.f32.gmra.mxu0 %v184_v22  ;;  %246 = vmatmul.f32.gmra.mxu1 %v188_v23 }
  0x5e   : > { %261 = vmatmul.f32.gmra.mxu2 %v193_v24  ;;  %273 = vmatmul.f32.gmra.mxu3 %v197_v25 }
  0x60   : > { %237 = vmatmul.f32.gmra.mxu0 %v185_v26  ;;  %249 = vmatmul.f32.gmra.mxu1 %v189_v27 }
  0x66   : > { %264 = vmatmul.f32.gmra.mxu2 %v194_v28  ;;  %276 = vmatmul.f32.gmra.mxu3 %v198_v29 }
  0x68   : > { %240 = vmatmul.f32.gmra.mxu0 %v186_v30  ;;  %252 = vmatmul.f32.gmra.mxu1 %v190_v31 }
  0xcd   : > { %v232_v32 = vpop.f32.mrf.mxu0  ;;  %v244_v33 = vpop.f32.mrf.mxu1 }
  0xce   : > { %280 = vst [vmem:[%s806_s15] sm:$0xff] %v232_v32 }
  0xcf   : > { %284 = vst [vmem:[%s806_s15 + $0x20] sm:$0xff] %v244_v33 }
  0xd1   : > { %v256_v34 = vpop.f32.mrf.mxu2  ;;  %v268_v35 = vpop.f32.mrf.mxu3 }
  0xd2   : > { %288 = vst [vmem:[%s806_s15 + $0x40] sm:$0xff] %v256_v34 }
  0xd3   : > { %292 = vst [vmem:[%s806_s15 + $0x60] sm:$0xff] %v268_v35 }
  0xd5   : > { %v235_v36 = vpop.f32.mrf.mxu0  ;;  %v247_v37 = vpop.f32.mrf.mxu1 }
  0xd6   : > { %281 = vst [vmem:[%s806_s15 + $0x8] sm:$0xff] %v235_v36 }
  0xd7   : > { %285 = vst [vmem:[%s806_s15 + $0x28] sm:$0xff] %v247_v37 }
  0xd9   : > { %v259_v38 = vpop.f32.mrf.mxu2  ;;  %v271_v39 = vpop.f32.mrf.mxu3 }
  0xda   : > { %289 = vst [vmem:[%s806_s15 + $0x48] sm:$0xff] %v259_v38 }
  0xdb   : > { %293 = vst [vmem:[%s806_s15 + $0x68] sm:$0xff] %v271_v39 }
  0xdd   : > { %v238_v40 = vpop.f32.mrf.mxu0  ;;  %v250_v41 = vpop.f32.mrf.mxu1 }
  0xde   : > { %282 = vst [vmem:[%s806_s15 + $0x10] sm:$0xff] %v238_v40 }
  0xdf   : > { %286 = vst [vmem:[%s806_s15 + $0x30] sm:$0xff] %v250_v41 }
  0xe1   : > { %v262_v42 = vpop.f32.mrf.mxu2  ;;  %v274_v43 = vpop.f32.mrf.mxu3 }
  0xe2   : > { %290 = vst [vmem:[%s806_s15 + $0x50] sm:$0xff] %v262_v42 }
  0xe3   : > { %294 = vst [vmem:[%s806_s15 + $0x70] sm:$0xff] %v274_v43 }
  0xe5   : > { %v241_v44 = vpop.f32.mrf.mxu0  ;;  %v253_v45 = vpop.f32.mrf.mxu1 }
  0xe6   : > { %283 = vst [vmem:[%s806_s15 + $0x18] sm:$0xff] %v241_v44 }
  0xe7   : > { %287 = vst [vmem:[%s806_s15 + $0x38] sm:$0xff] %v253_v45 }
  0xe9   : > { %v265_v46 = vpop.f32.mrf.mxu2  ;;  %v277_v47 = vpop.f32.mrf.mxu3 }
  0xea   : > { %291 = vst [vmem:[%s806_s15 + $0x58] sm:$0xff] %v265_v46 }
  0xeb   : > { %295 = vst [vmem:[%s806_s15 + $0x78] sm:$0xff] %v277_v47 }
  0xec   : > { %609 = shalt.err (!%p606_p10)
}
  0xed   : > { %s657_s5 = smov 128   ;;  %s658_s30 = smov 8  }
  0xee   : > { %467 = dma.vmem_to_hbm [thread:$0]  (%p742_p0), %s310_s17, 2048, %s312_s18, %s297_s13, %s657_s5, %s657_s5, %s658_s30  }
  0xef PF: > { %p484_p11 = scmp.ge.s32.totalorder %s652_s12, 2  ;;  %s326_s6 = sand.u32 1, %s640_s9  }
  0xf0   : > { %s327_s7 = scalar_lea.sflag [#allocation4], %s326_s6 }
  0xf1   : > { %p478_p12 = pnand %p484_p11, %p709_p6 }
  0xf3   : > { %p479_p13 = pneg %p478_p12 }
  0xf5   : > { %635 = dma.done.wait (%p479_p13), %s327_s7, 2048  }
  0xf6   : > { %637 = vsyncadd (%p479_p13), %s327_s7, 4294965248  ;;  %p16_p3 = scmp.ge.s32.totalorder %s726_s23, 5   ;;  %s865_s9 = smov %s644_s10 }
  0xf7   : > { %s866_s10 = smov %s648_s11  ;;  %s867_s11 = smov %s738_s28 }
  0xf8   : > { %s868_s12 = smov %s726_s23  ;;  %18 = sbr.rel (!%p16_p3) target bundleno = 6 (0x6), region = 77 }
  0xfd   :  { %333 = vsyncpa [#allocation3], 1 }
  0xfe   :  { %335 = vsyncpa [#allocation3 + $0x1], 1 }
  0xff   :  { %336 = vsyncpa [#allocation6], 1 }
 0x100   :  { %337 = vsyncpa [#allocation4], 1 }
 0x101   :  { %339 = vsyncpa [#allocation4 + $0x1], 1 }

</bundles_post_ra>
